<compile_context>
chip_gen: v5e
topology: v5e:2x2
jax: 0.10.0
libtpu: 0.0.40
codegen_flags: <defaults>
</compile_context>

<pallas_src>
import functools

import jax
import jax.numpy as jnp
from jax.experimental import pallas as pl
from jax.experimental.pallas import tpu as pltpu

LANE = 128


def _round_up(x, m):
    return ((x + m - 1) // m) * m


def _pick_tile(b):
    # Batch tile: multiple of 8 (sublane), capped at 256 rows.  Even with
    # double buffering, 3 x (256, 128) f32 activation tiles + ~6 x (128, 128)
    # resident weight tiles stay far below the 32 MiB scoped VMEM default
    # (and v7x's 64 MiB physical VMEM).
    return min(256, _round_up(b, 8))


# ----------------------------- Pallas kernels ------------------------------

def _fused_policy_q_kernel(s_ref, wp_ref, bp_ref,
                           w1s_ref, w1a_ref, b1_ref,
                           w2_ref, b2_ref, wh_ref, bh_ref,
                           a_ref, q_ref):
    # Fused Policy_Q.forward + concat + forward_Q for one batch tile:
    #   a  = s @ Wp + bp
    #   h1 = relu(s @ W1[:ni] + a @ W1[ni:] + b1)   == relu([s, a] @ W1 + b1)
    #   h2 = relu(h1 @ W2 + b2)
    #   q  = h2 @ Wh + bh
    s = s_ref[...]
    a = jnp.dot(s, wp_ref[...], preferred_element_type=jnp.float32) + bp_ref[...]
    a_ref[...] = a
    h1 = (jnp.dot(s, w1s_ref[...], preferred_element_type=jnp.float32)
          + jnp.dot(a, w1a_ref[...], preferred_element_type=jnp.float32)
          + b1_ref[...])
    h1 = jnp.maximum(h1, 0.0)
    h2 = jnp.dot(h1, w2_ref[...], preferred_element_type=jnp.float32) + b2_ref[...]
    h2 = jnp.maximum(h2, 0.0)
    q_ref[...] = (jnp.dot(h2, wh_ref[...], preferred_element_type=jnp.float32)
                  + bh_ref[...])


def _q_kernel(sa_ref, w1_ref, b1_ref, w2_ref, b2_ref, wh_ref, bh_ref, q_ref):
    # Standalone forward_Q(s_a) for externally formed s_a (e.g. train_Q data).
    h1 = (jnp.dot(sa_ref[...], w1_ref[...], preferred_element_type=jnp.float32)
          + b1_ref[...])
    h1 = jnp.maximum(h1, 0.0)
    h2 = jnp.dot(h1, w2_ref[...], preferred_element_type=jnp.float32) + b2_ref[...]
    h2 = jnp.maximum(h2, 0.0)
    q_ref[...] = (jnp.dot(h2, wh_ref[...], preferred_element_type=jnp.float32)
                  + bh_ref[...])


def _full(shape):
    # Grid-invariant (weight/bias) block: whole array, kept resident in VMEM.
    return pl.BlockSpec(shape, lambda i: (0,) * len(shape))


# ------------------------------- wrappers -----------------------------------

@functools.partial(jax.jit, static_argnames=("num_outputs",))
def policy_and_q(s, pp, *, num_outputs):
    """Fused Policy_Q.forward(s) and forward_Q(cat([s, policy(s)], 1)).

    Returns (a, q) with a: (B, num_outputs), q: (B, 1).
    """
    B, ni = s.shape
    ni_p, no_p = pp["w_policy"].shape
    nh_p = pp["w2"].shape[0]
    head_p = pp["wh"].shape[1]

    tb = _pick_tile(B)
    bp = _round_up(B, tb)
    s_p = jnp.zeros((bp, ni_p), jnp.float32).at[:B, :ni].set(s.astype(jnp.float32))

    flops = 2 * bp * (ni_p * no_p + ni_p * nh_p + no_p * nh_p
                      + nh_p * nh_p + nh_p * head_p)
    bytes_accessed = 4 * (bp * ni_p + ni_p * no_p + no_p
                          + ni_p * nh_p + no_p * nh_p + nh_p
                          + nh_p * nh_p + nh_p + nh_p * head_p + head_p
                          + bp * no_p + bp * head_p)

    a_pad, q_pad = pl.pallas_call(
        _fused_policy_q_kernel,
        out_shape=(jax.ShapeDtypeStruct((bp, no_p), jnp.float32),
                   jax.ShapeDtypeStruct((bp, head_p), jnp.float32)),
        grid_spec=pltpu.PrefetchScalarGridSpec(
            num_scalar_prefetch=0,
            grid=(bp // tb,),
            in_specs=[
                pl.BlockSpec((tb, ni_p), lambda i: (i, 0)),   # s tile
                _full((ni_p, no_p)), _full((1, no_p)),        # policy W, b
                _full((ni_p, nh_p)), _full((no_p, nh_p)),     # W1 split (s / a rows)
                _full((1, nh_p)),                             # b1
                _full((nh_p, nh_p)), _full((1, nh_p)),        # W2, b2
                _full((nh_p, head_p)), _full((1, head_p)),    # W_head, b_head
            ],
            out_specs=[
                pl.BlockSpec((tb, no_p), lambda i: (i, 0)),   # a (lane-dense)
                pl.BlockSpec((tb, head_p), lambda i: (i, 0)), # q (lane-dense)
            ],
        ),
        compiler_params=pltpu.CompilerParams(dimension_semantics=("parallel",)),
        cost_estimate=pl.CostEstimate(flops=flops, transcendentals=0,
                                      bytes_accessed=bytes_accessed),
    )(s_p,
      pp["w_policy"], pp["b_policy"],
      pp["w1_s"], pp["w1_a"], pp["b1"],
      pp["w2"], pp["b2"], pp["wh"], pp["bh"])

    return a_pad[:B, :num_outputs], q_pad[:B, :1]


@jax.jit
def forward_Q(s_a, pp):
    """Policy_Q.forward_Q(s_a) for an externally formed s_a: (B, 1) q-values."""
    B, nsa = s_a.shape
    nsa_p = pp["w1_full"].shape[0]
    nh_p = pp["w2"].shape[0]
    head_p = pp["wh"].shape[1]

    tb = _pick_tile(B)
    bp = _round_up(B, tb)
    sa_p = jnp.zeros((bp, nsa_p), jnp.float32).at[:B, :nsa].set(
        s_a.astype(jnp.float32))

    flops = 2 * bp * (nsa_p * nh_p + nh_p * nh_p + nh_p * head_p)
    bytes_accessed = 4 * (bp * nsa_p + nsa_p * nh_p + nh_p + nh_p * nh_p + nh_p
                          + nh_p * head_p + head_p + bp * head_p)

    q_pad = pl.pallas_call(
        _q_kernel,
        out_shape=jax.ShapeDtypeStruct((bp, head_p), jnp.float32),
        grid_spec=pltpu.PrefetchScalarGridSpec(
            num_scalar_prefetch=0,
            grid=(bp // tb,),
            in_specs=[
                pl.BlockSpec((tb, nsa_p), lambda i: (i, 0)),
                _full((nsa_p, nh_p)), _full((1, nh_p)),
                _full((nh_p, nh_p)), _full((1, nh_p)),
                _full((nh_p, head_p)), _full((1, head_p)),
            ],
            out_specs=pl.BlockSpec((tb, head_p), lambda i: (i, 0)),
        ),
        compiler_params=pltpu.CompilerParams(dimension_semantics=("parallel",)),
        cost_estimate=pl.CostEstimate(flops=flops, transcendentals=0,
                                      bytes_accessed=bytes_accessed),
    )(sa_p, pp["w1_full"], pp["b1"], pp["w2"], pp["b2"], pp["wh"], pp["bh"])

    return q_pad[:B, :1]


# --------------------------- parameter creation ------------------------------

def init_params(key, num_inputs, num_hidden, num_outputs):
    """Torch-faithful (unpadded) params. nn.Linear default init U(-k, k),
    k = 1/sqrt(fan_in); Q_head then scaled by 0.1 (weight) / 0.0 (bias)."""
    # TODO(synk): Policy_Q.__init__ also calls nn.init.uniform_ on self.affine1,
    # which does not exist on this module (would raise in PyTorch); skipped.
    def linear(key, fan_in, fan_out):
        kw, kb = jax.random.split(key)
        bound = 1.0 / jnp.sqrt(jnp.float32(fan_in))
        w = jax.random.uniform(kw, (fan_in, fan_out), jnp.float32, -bound, bound)
        b = jax.random.uniform(kb, (1, fan_out), jnp.float32, -bound, bound)
        return w, b

    k_p, k_q1, k_q2, k_qh = jax.random.split(key, 4)
    w_policy, b_policy = linear(k_p, num_inputs, num_outputs)
    w1, b1 = linear(k_q1, num_inputs + num_outputs, num_hidden)
    w2, b2 = linear(k_q2, num_hidden, num_hidden)
    wh, bh = linear(k_qh, num_hidden, 1)
    wh = wh * 0.1      # self.Q_head.weight.data.mul_(0.1)
    bh = bh * 0.0      # self.Q_head.bias.data.mul_(0.0)
    return dict(w_policy=w_policy, b_policy=b_policy,
                w1=w1, b1=b1, w2=w2, b2=b2, wh=wh, bh=bh)


def pad_params(p):
    """Zero-pad every feature dim to a multiple of 128 (lane-dense kernel layout)
    and split W1 rows into the s-part and a-part (done once, outside the jit)."""
    ni, no = p["w_policy"].shape
    nh = p["w2"].shape[0]
    ni_p = _round_up(ni, LANE)
    no_p = _round_up(no, LANE)
    nh_p = _round_up(nh, LANE)
    head_p = _round_up(1, LANE)
    nsa_p = _round_up(ni + no, LANE)

    def pad2(x, r, c):
        return jnp.pad(x, ((0, r - x.shape[0]), (0, c - x.shape[1])))

    w1 = p["w1"]
    return dict(
        w_policy=pad2(p["w_policy"], ni_p, no_p),
        b_policy=pad2(p["b_policy"], 1, no_p),
        w1_s=pad2(w1[:ni], ni_p, nh_p),
        w1_a=pad2(w1[ni:], no_p, nh_p),
        w1_full=pad2(w1, nsa_p, nh_p),
        b1=pad2(p["b1"], 1, nh_p),
        w2=pad2(p["w2"], nh_p, nh_p),
        b2=pad2(p["b2"], 1, nh_p),
        wh=pad2(p["wh"], nh_p, head_p),
        bh=pad2(p["bh"], 1, head_p),
    )


# ---------------------------------- main -------------------------------------

if __name__ == "__main__":
    B = 8
    num_inputs = 16
    num_hidden = 32
    num_outputs = 8

    key = jax.random.PRNGKey(0)
    k_params, k_s = jax.random.split(key)
    params = init_params(k_params, num_inputs, num_hidden, num_outputs)
    pp = pad_params(params)

    s = jax.random.normal(k_s, (B, num_inputs), jnp.float32)

    # fused: forward(s) -> a, forward_Q(cat([s, a], 1)) -> q, one pallas_call
    a, q = policy_and_q(s, pp, num_outputs=num_outputs)
    a, q = jax.block_until_ready((a, q))

    # standalone forward_Q on an externally formed s_a (module-method parity)
    s_a = jnp.concatenate([s, a], axis=1)
    q2 = jax.block_until_ready(forward_Q(s_a, pp))

    # pure-JAX reference check
    a_ref = s @ params["w_policy"] + params["b_policy"]
    sa_ref = jnp.concatenate([s, a_ref], axis=1)
    h1 = jnp.maximum(sa_ref @ params["w1"] + params["b1"], 0.0)
    h2 = jnp.maximum(h1 @ params["w2"] + params["b2"], 0.0)
    q_ref = h2 @ params["wh"] + params["bh"]

    assert a.shape == (B, num_outputs) and q.shape == (B, 1)
    assert jnp.allclose(a, a_ref, atol=1e-5, rtol=1e-5)
    assert jnp.allclose(q, q_ref, atol=1e-5, rtol=1e-5)
    assert jnp.allclose(q2, q_ref, atol=1e-5, rtol=1e-5)

    print("KERNEL_OK")
</pallas_src>

<mosaic_0001>
module attributes {stable_mosaic.version = 11 : i64} {
  func.func @_fused_policy_q_kernel(%arg0: i32, %arg1: memref<8x128xf32, #tpu.memory_space<vmem>>, %arg2: memref<128x128xf32, #tpu.memory_space<vmem>>, %arg3: memref<1x128xf32, #tpu.memory_space<vmem>>, %arg4: memref<128x128xf32, #tpu.memory_space<vmem>>, %arg5: memref<128x128xf32, #tpu.memory_space<vmem>>, %arg6: memref<1x128xf32, #tpu.memory_space<vmem>>, %arg7: memref<128x128xf32, #tpu.memory_space<vmem>>, %arg8: memref<1x128xf32, #tpu.memory_space<vmem>>, %arg9: memref<128x128xf32, #tpu.memory_space<vmem>>, %arg10: memref<1x128xf32, #tpu.memory_space<vmem>>, %arg11: memref<8x128xf32, #tpu.memory_space<vmem>>, %arg12: memref<8x128xf32, #tpu.memory_space<vmem>>) attributes {dimension_semantics = [#tpu.dimension_semantics<parallel>], iteration_bounds = array<i64: 1>, scalar_prefetch = 0 : i64, scratch_operands = 0 : i64, tpu.core_type = #tpu.core_type<tc>, window_params = [{transform_indices = @transform_0, window_bounds = array<i64: 8, 128>}, {pipeline_mode = #tpu.pipeline_mode<synchronous>, transform_indices = @transform_1, window_bounds = array<i64: 128, 128>}, {pipeline_mode = #tpu.pipeline_mode<synchronous>, transform_indices = @transform_2, window_bounds = array<i64: 1, 128>}, {pipeline_mode = #tpu.pipeline_mode<synchronous>, transform_indices = @transform_3, window_bounds = array<i64: 128, 128>}, {pipeline_mode = #tpu.pipeline_mode<synchronous>, transform_indices = @transform_4, window_bounds = array<i64: 128, 128>}, {pipeline_mode = #tpu.pipeline_mode<synchronous>, transform_indices = @transform_5, window_bounds = array<i64: 1, 128>}, {pipeline_mode = #tpu.pipeline_mode<synchronous>, transform_indices = @transform_6, window_bounds = array<i64: 128, 128>}, {pipeline_mode = #tpu.pipeline_mode<synchronous>, transform_indices = @transform_7, window_bounds = array<i64: 1, 128>}, {pipeline_mode = #tpu.pipeline_mode<synchronous>, transform_indices = @transform_8, window_bounds = array<i64: 128, 128>}, {pipeline_mode = #tpu.pipeline_mode<synchronous>, transform_indices = @transform_9, window_bounds = array<i64: 1, 128>}, {transform_indices = @transform_10, window_bounds = array<i64: 8, 128>}, {transform_indices = @transform_11, window_bounds = array<i64: 8, 128>}]} {
    %c0 = arith.constant 0 : index
    %c0_0 = arith.constant 0 : index
    %0 = vector.load %arg1[%c0, %c0_0] : memref<8x128xf32, #tpu.memory_space<vmem>>, vector<8x128xf32>
    %c0_1 = arith.constant 0 : index
    %c0_2 = arith.constant 0 : index
    %1 = vector.load %arg2[%c0_1, %c0_2] : memref<128x128xf32, #tpu.memory_space<vmem>>, vector<128x128xf32>
    %cst = arith.constant dense<0.000000e+00> : vector<8x128xf32>
    %2 = tpu.matmul %0, %1, %cst {dimension_numbers = #tpu.dot_dimension_numbers<[1], [0], [0], [1], [0, 0, 1, 1], [], []>} : vector<8x128xf32>, vector<128x128xf32>, vector<8x128xf32> -> vector<8x128xf32>
    %c0_3 = arith.constant 0 : index
    %c0_4 = arith.constant 0 : index
    %3 = vector.load %arg3[%c0_3, %c0_4] : memref<1x128xf32, #tpu.memory_space<vmem>>, vector<1x128xf32>
    %4 = vector.broadcast %3 : vector<1x128xf32> to vector<8x128xf32>
    %5 = arith.addf %2, %4 : vector<8x128xf32>
    %c0_5 = arith.constant 0 : index
    %c0_6 = arith.constant 0 : index
    %6 = vector.load %arg11[%c0_5, %c0_6] : memref<8x128xf32, #tpu.memory_space<vmem>>, vector<8x128xf32>
    tpu.vector_store %arg11[%c0_5, %c0_6], %5 {strides = array<i32>} : memref<8x128xf32, #tpu.memory_space<vmem>>, vector<8x128xf32>,
    %c0_7 = arith.constant 0 : index
    %c0_8 = arith.constant 0 : index
    %7 = vector.load %arg4[%c0_7, %c0_8] : memref<128x128xf32, #tpu.memory_space<vmem>>, vector<128x128xf32>
    %cst_9 = arith.constant dense<0.000000e+00> : vector<8x128xf32>
    %8 = tpu.matmul %0, %7, %cst_9 {dimension_numbers = #tpu.dot_dimension_numbers<[1], [0], [0], [1], [0, 0, 1, 1], [], []>} : vector<8x128xf32>, vector<128x128xf32>, vector<8x128xf32> -> vector<8x128xf32>
    %c0_10 = arith.constant 0 : index
    %c0_11 = arith.constant 0 : index
    %9 = vector.load %arg5[%c0_10, %c0_11] : memref<128x128xf32, #tpu.memory_space<vmem>>, vector<128x128xf32>
    %cst_12 = arith.constant dense<0.000000e+00> : vector<8x128xf32>
    %10 = tpu.matmul %5, %9, %cst_12 {dimension_numbers = #tpu.dot_dimension_numbers<[1], [0], [0], [1], [0, 0, 1, 1], [], []>} : vector<8x128xf32>, vector<128x128xf32>, vector<8x128xf32> -> vector<8x128xf32>
    %11 = arith.addf %8, %10 : vector<8x128xf32>
    %c0_13 = arith.constant 0 : index
    %c0_14 = arith.constant 0 : index
    %12 = vector.load %arg6[%c0_13, %c0_14] : memref<1x128xf32, #tpu.memory_space<vmem>>, vector<1x128xf32>
    %13 = vector.broadcast %12 : vector<1x128xf32> to vector<8x128xf32>
    %14 = arith.addf %11, %13 : vector<8x128xf32>
    %cst_15 = arith.constant 0.000000e+00 : f32
    %15 = vector.broadcast %cst_15 : f32 to vector<8x128xf32>
    %16 = arith.maximumf %14, %15 : vector<8x128xf32>
    %c0_16 = arith.constant 0 : index
    %c0_17 = arith.constant 0 : index
    %17 = vector.load %arg7[%c0_16, %c0_17] : memref<128x128xf32, #tpu.memory_space<vmem>>, vector<128x128xf32>
    %cst_18 = arith.constant dense<0.000000e+00> : vector<8x128xf32>
    %18 = tpu.matmul %16, %17, %cst_18 {dimension_numbers = #tpu.dot_dimension_numbers<[1], [0], [0], [1], [0, 0, 1, 1], [], []>} : vector<8x128xf32>, vector<128x128xf32>, vector<8x128xf32> -> vector<8x128xf32>
    %c0_19 = arith.constant 0 : index
    %c0_20 = arith.constant 0 : index
    %19 = vector.load %arg8[%c0_19, %c0_20] : memref<1x128xf32, #tpu.memory_space<vmem>>, vector<1x128xf32>
    %20 = vector.broadcast %19 : vector<1x128xf32> to vector<8x128xf32>
    %21 = arith.addf %18, %20 : vector<8x128xf32>
    %cst_21 = arith.constant 0.000000e+00 : f32
    %22 = vector.broadcast %cst_21 : f32 to vector<8x128xf32>
    %23 = arith.maximumf %21, %22 : vector<8x128xf32>
    %c0_22 = arith.constant 0 : index
    %c0_23 = arith.constant 0 : index
    %24 = vector.load %arg9[%c0_22, %c0_23] : memref<128x128xf32, #tpu.memory_space<vmem>>, vector<128x128xf32>
    %cst_24 = arith.constant dense<0.000000e+00> : vector<8x128xf32>
    %25 = tpu.matmul %23, %24, %cst_24 {dimension_numbers = #tpu.dot_dimension_numbers<[1], [0], [0], [1], [0, 0, 1, 1], [], []>} : vector<8x128xf32>, vector<128x128xf32>, vector<8x128xf32> -> vector<8x128xf32>
    %c0_25 = arith.constant 0 : index
    %c0_26 = arith.constant 0 : index
    %26 = vector.load %arg10[%c0_25, %c0_26] : memref<1x128xf32, #tpu.memory_space<vmem>>, vector<1x128xf32>
    %27 = vector.broadcast %26 : vector<1x128xf32> to vector<8x128xf32>
    %28 = arith.addf %25, %27 : vector<8x128xf32>
    %c0_27 = arith.constant 0 : index
    %c0_28 = arith.constant 0 : index
    %29 = vector.load %arg12[%c0_27, %c0_28] : memref<8x128xf32, #tpu.memory_space<vmem>>, vector<8x128xf32>
    tpu.vector_store %arg12[%c0_27, %c0_28], %28 {strides = array<i32>} : memref<8x128xf32, #tpu.memory_space<vmem>>, vector<8x128xf32>,
    return
  }
  func.func @transform_0(%arg0: i32) -> (i32, i32) {
    %c0_i32 = arith.constant 0 : i32
    %c0_i32_0 = arith.constant 0 : i32
    return %arg0, %c0_i32 : i32, i32
  }
  func.func @transform_1(%arg0: i32) -> (i32, i32) {
    %c0_i32 = arith.constant 0 : i32
    %c0_i32_0 = arith.constant 0 : i32
    %c0_i32_1 = arith.constant 0 : i32
    return %c0_i32, %c0_i32_0 : i32, i32
  }
  func.func @transform_2(%arg0: i32) -> (i32, i32) {
    %c0_i32 = arith.constant 0 : i32
    %c0_i32_0 = arith.constant 0 : i32
    %c0_i32_1 = arith.constant 0 : i32
    return %c0_i32, %c0_i32_0 : i32, i32
  }
  func.func @transform_3(%arg0: i32) -> (i32, i32) {
    %c0_i32 = arith.constant 0 : i32
    %c0_i32_0 = arith.constant 0 : i32
    %c0_i32_1 = arith.constant 0 : i32
    return %c0_i32, %c0_i32_0 : i32, i32
  }
  func.func @transform_4(%arg0: i32) -> (i32, i32) {
    %c0_i32 = arith.constant 0 : i32
    %c0_i32_0 = arith.constant 0 : i32
    %c0_i32_1 = arith.constant 0 : i32
    return %c0_i32, %c0_i32_0 : i32, i32
  }
  func.func @transform_5(%arg0: i32) -> (i32, i32) {
    %c0_i32 = arith.constant 0 : i32
    %c0_i32_0 = arith.constant 0 : i32
    %c0_i32_1 = arith.constant 0 : i32
    return %c0_i32, %c0_i32_0 : i32, i32
  }
  func.func @transform_6(%arg0: i32) -> (i32, i32) {
    %c0_i32 = arith.constant 0 : i32
    %c0_i32_0 = arith.constant 0 : i32
    %c0_i32_1 = arith.constant 0 : i32
    return %c0_i32, %c0_i32_0 : i32, i32
  }
  func.func @transform_7(%arg0: i32) -> (i32, i32) {
    %c0_i32 = arith.constant 0 : i32
    %c0_i32_0 = arith.constant 0 : i32
    %c0_i32_1 = arith.constant 0 : i32
    return %c0_i32, %c0_i32_0 : i32, i32
  }
  func.func @transform_8(%arg0: i32) -> (i32, i32) {
    %c0_i32 = arith.constant 0 : i32
    %c0_i32_0 = arith.constant 0 : i32
    %c0_i32_1 = arith.constant 0 : i32
    return %c0_i32, %c0_i32_0 : i32, i32
  }
  func.func @transform_9(%arg0: i32) -> (i32, i32) {
    %c0_i32 = arith.constant 0 : i32
    %c0_i32_0 = arith.constant 0 : i32
    %c0_i32_1 = arith.constant 0 : i32
    return %c0_i32, %c0_i32_0 : i32, i32
  }
  func.func @transform_10(%arg0: i32) -> (i32, i32) {
    %c0_i32 = arith.constant 0 : i32
    %c0_i32_0 = arith.constant 0 : i32
    return %arg0, %c0_i32 : i32, i32
  }
  func.func @transform_11(%arg0: i32) -> (i32, i32) {
    %c0_i32 = arith.constant 0 : i32
    %c0_i32_0 = arith.constant 0 : i32
    return %arg0, %c0_i32 : i32, i32
  }
}

</mosaic_0001>

<bundles_post_ra>
// kernel: policy_and_q.1
= control target key start
LH: loop header
LB: loop body
LE: loop exit
PB: predicated region body
PF: predicated region fallthrough
CT: control target
= control target key end

     0   :  { %17 = vsyncpa [#allocation3], 0  ;;  %s609_s0 = inlined_call_operand.vmem [shape: f32[8,128], index: 0, kind: input, shape index: {}]   ;;  %s610_s1 = inlined_call_operand.hbm [shape: f32[128,128], index: 1, kind: input, shape index: {}]   ;;  %s611_s2 = inlined_call_operand.vmem [shape: f32[1,128], index: 2, kind: input, shape index: {}]   ;;  %s612_s3 = inlined_call_operand.hbm [shape: f32[128,128], index: 3, kind: input, shape index: {}]   ;;  %s613_s4 = inlined_call_operand.hbm [shape: f32[128,128], index: 4, kind: input, shape index: {}]   ;;  %s614_s5 = inlined_call_operand.vmem [shape: f32[1,128], index: 5, kind: input, shape index: {}]   ;;  %s615_s6 = inlined_call_operand.hbm [shape: f32[128,128], index: 6, kind: input, shape index: {}]   ;;  %s616_s7 = inlined_call_operand.vmem [shape: f32[1,128], index: 7, kind: input, shape index: {}]   ;;  %s617_s8 = inlined_call_operand.hbm [shape: f32[128,128], index: 8, kind: input, shape index: {}]   ;;  %s618_s9 = inlined_call_operand.vmem [shape: f32[1,128], index: 9, kind: input, shape index: {}]   ;;  %s619_s10 = inlined_call_operand.hbm [shape: f32[8,128], index: 10, kind: output, shape index: {0}]   ;;  %s620_s11 = inlined_call_operand.vmem [shape: f32[8,128], index: 11, kind: output, shape index: {1}]  }
   0x1   :  { %18 = vsyncpa [#allocation6], 0 }
   0x2   :  { %19 = vsyncpa [#allocation9], 0 }
   0x3   :  { %20 = vsyncpa [#allocation4], 0  ;;  %s42_s19 = sshll.u32 %s612_s3, 4  ;;  %s505_s20 = smov [#allocation5]   ;;  %s43_s19 = int_to_ptr.hbm [resolvable:$true] %s42_s19 }
   0x4   :  { %s44_s21 = sshll.u32 %s505_s20, 4  ;;  %s70_s24 = sshll.u32 %s615_s6, 4  ;;  %s45_s21 = int_to_ptr.vmem [resolvable:$true] %s44_s21  ;;  %s71_s24 = int_to_ptr.hbm [resolvable:$true] %s70_s24 }
   0x5   :  { %s506_s25 = smov 128   ;;  %s507_s26 = smov 8  }
   0x6   :  { %50 = dma.hbm_to_vmem [thread:$0]  %s43_s19, 2048, %s45_s21, [#allocation6], %s506_s25, %s506_s25, %s507_s26  }
   0x7   :  { %s508_s27 = smov [#allocation8]   ;;  %s27_s12 = sshll.u32 %s610_s1, 4  ;;  %s28_s12 = int_to_ptr.hbm [resolvable:$true] %s27_s12 }
   0x8   :  { %s72_s28 = sshll.u32 %s508_s27, 4  ;;  %s55_s14 = sshll.u32 %s613_s4, 4  ;;  %s73_s28 = int_to_ptr.vmem [resolvable:$true] %s72_s28  ;;  %s56_s14 = int_to_ptr.hbm [resolvable:$true] %s55_s14 }
   0x9   :  { %78 = dma.hbm_to_vmem [thread:$0]  %s71_s24, 2048, %s73_s28, [#allocation9], %s506_s25, %s506_s25, %s507_s26  }
   0xa   :  { %s509_s15 = smov [#allocation2]   ;;  %s510_s6 = smov [#allocation7]  }
   0xb   :  { %s29_s16 = sshll.u32 %s509_s15, 4  ;;  %s57_s17 = sshll.u32 %s510_s6, 4  ;;  %s30_s16 = int_to_ptr.vmem [resolvable:$true] %s29_s16  ;;  %s58_s17 = int_to_ptr.vmem [resolvable:$true] %s57_s17 }
   0xc   :  { %35 = dma.hbm_to_vmem [thread:$0]  %s28_s12, 2048, %s30_s16, [#allocation3], %s506_s25, %s506_s25, %s507_s26  }
   0xd   :  { %s85_s20 = sshll.u32 %s617_s8, 4  ;;  %s511_s1 = smov [#allocation10]   ;;  %s86_s20 = int_to_ptr.hbm [resolvable:$true] %s85_s20 }
   0xe   :  { %63 = dma.hbm_to_vmem [thread:$0]  %s56_s14, 2048, %s58_s17, [#allocation6], %s506_s25, %s506_s25, %s507_s26  }
   0xf   :  { %s87_s21 = sshll.u32 %s511_s1, 4  ;;  %s88_s21 = int_to_ptr.vmem [resolvable:$true] %s87_s21 }
  0x10   :  { %93 = dma.hbm_to_vmem [thread:$0]  %s86_s20, 2048, %s88_s21, [#allocation9], %s506_s25, %s506_s25, %s507_s26  }
  0x11   :  { %497 = dma.done.wait [#allocation3], 2048  }
  0x12   :  { %498 = vsyncadd [#allocation3], 4294965248 }
  0x13   :  { %499 = dma.done.wait [#allocation6], 4096  }
  0x14   :  { %500 = vsyncadd [#allocation6], 4294963200 }
  0x15   :  { %501 = dma.done.wait [#allocation9], 4096  }
  0x16   :  { %502 = vsyncadd [#allocation9], 4294963200  ;;  %v132_v0 = vld [vmem:[#allocation2 + $0x78] sm:$0xff]  ;;  %v131_v1 = vld [vmem:[#allocation2 + $0x70] sm:$0xff]  ;;  %s325_s29 = sshll.u32 %s619_s10, 4  ;;  %s326_s29 = int_to_ptr.hbm [resolvable:$true] %s325_s29 }
  0x17   :  { %137 = vmatpush.msra.mxu0 %v132_v0  ;;  %v130_v2 = vld [vmem:[#allocation2 + $0x68] sm:$0xff]  ;;  %v129_v3 = vld [vmem:[#allocation2 + $0x60] sm:$0xff]  ;;  %v173_v4 = vld [vmem:[#allocation5 + $0x78] sm:$0xff] }
  0x18   :  { %v128_v5 = vld [vmem:[#allocation2 + $0x58] sm:$0xff]  ;;  %210 = vmatpush.msra.mxu2 %v173_v4  ;;  %v172_v6 = vld [vmem:[#allocation5 + $0x70] sm:$0xff]  ;;  %v171_v8 = vld [vmem:[#allocation5 + $0x68] sm:$0xff] }
  0x19   :  { %138 = vmatpush.msra.mxu0 %v131_v1  ;;  %v189_v7 = vld [vmem:[#allocation7 + $0x78] sm:$0xff]  ;;  %v188_v9 = vld [vmem:[#allocation7 + $0x70] sm:$0xff]  ;;  %v187_v11 = vld [vmem:[#allocation7 + $0x68] sm:$0xff] }
  0x1a   :  { %190 = vmatpush.msra.mxu1 %v189_v7  ;;  %v127_v10 = vld [vmem:[#allocation2 + $0x50] sm:$0xff]  ;;  %211 = vmatpush.msra.mxu2 %v172_v6  ;;  %v170_v12 = vld [vmem:[#allocation5 + $0x60] sm:$0xff]  ;;  %v126_v13 = vld [vmem:[#allocation2 + $0x48] sm:$0xff] }
  0x1b   :  { %139 = vmatpush.msra.mxu0 %v130_v2  ;;  %v186_v14 = vld [vmem:[#allocation7 + $0x60] sm:$0xff]  ;;  %v169_v15 = vld [vmem:[#allocation5 + $0x58] sm:$0xff]  ;;  %v168_v18 = vld [vmem:[#allocation5 + $0x50] sm:$0xff] }
  0x1c   :  { %191 = vmatpush.msra.mxu1 %v188_v9  ;;  %212 = vmatpush.msra.mxu2 %v171_v8  ;;  %v125_v16 = vld [vmem:[#allocation2 + $0x40] sm:$0xff]  ;;  %v185_v17 = vld [vmem:[#allocation7 + $0x58] sm:$0xff]  ;;  %v184_v20 = vld [vmem:[#allocation7 + $0x50] sm:$0xff] }
  0x1d   :  { %140 = vmatpush.msra.mxu0 %v129_v3  ;;  %v124_v19 = vld [vmem:[#allocation2 + $0x38] sm:$0xff]  ;;  %v123_v21 = vld [vmem:[#allocation2 + $0x30] sm:$0xff]  ;;  %v167_v22 = vld [vmem:[#allocation5 + $0x48] sm:$0xff] }
  0x1e   :  { %192 = vmatpush.msra.mxu1 %v187_v11  ;;  %213 = vmatpush.msra.mxu2 %v170_v12  ;;  %v183_v23 = vld [vmem:[#allocation7 + $0x48] sm:$0xff]  ;;  %v166_v24 = vld [vmem:[#allocation5 + $0x40] sm:$0xff]  ;;  %v165_v27 = vld [vmem:[#allocation5 + $0x38] sm:$0xff] }
  0x1f   :  { %141 = vmatpush.msra.mxu0 %v128_v5  ;;  %v122_v25 = vld [vmem:[#allocation2 + $0x28] sm:$0xff]  ;;  %v182_v26 = vld [vmem:[#allocation7 + $0x40] sm:$0xff]  ;;  %v181_v29 = vld [vmem:[#allocation7 + $0x38] sm:$0xff] }
  0x20   :  { %193 = vmatpush.msra.mxu1 %v186_v14  ;;  %214 = vmatpush.msra.mxu2 %v169_v15  ;;  %v121_v28 = vld [vmem:[#allocation2 + $0x20] sm:$0xff]  ;;  %v164_v30 = vld [vmem:[#allocation5 + $0x30] sm:$0xff]  ;;  %v120_v31 = vld [vmem:[#allocation2 + $0x18] sm:$0xff] }
  0x21   :  { %142 = vmatpush.msra.mxu0 %v127_v10  ;;  %v180_v32 = vld [vmem:[#allocation7 + $0x30] sm:$0xff]  ;;  %v163_v33 = vld [vmem:[#allocation5 + $0x28] sm:$0xff]  ;;  %v162_v36 = vld [vmem:[#allocation5 + $0x20] sm:$0xff] }
  0x22   :  { %194 = vmatpush.msra.mxu1 %v185_v17  ;;  %215 = vmatpush.msra.mxu2 %v168_v18  ;;  %v119_v34 = vld [vmem:[#allocation2 + $0x10] sm:$0xff]  ;;  %v179_v35 = vld [vmem:[#allocation7 + $0x28] sm:$0xff]  ;;  %v178_v38 = vld [vmem:[#allocation7 + $0x20] sm:$0xff] }
  0x23   :  { %143 = vmatpush.msra.mxu0 %v126_v13  ;;  %v118_v37 = vld [vmem:[#allocation2 + $0x8] sm:$0xff]  ;;  %v161_v39 = vld [vmem:[#allocation5 + $0x18] sm:$0xff]  ;;  %v117_v40 = vld [vmem:[#allocation2] sm:$0xff] }
  0x24   :  { %195 = vmatpush.msra.mxu1 %v184_v20  ;;  %216 = vmatpush.msra.mxu2 %v167_v22  ;;  %v177_v41 = vld [vmem:[#allocation7 + $0x18] sm:$0xff]  ;;  %v116_v42 = vld [vmem:[%s609_s0] sm:$0xff]  ;;  %v160_v43 = vld [vmem:[#allocation5 + $0x10] sm:$0xff] }
  0x25   :  { %144 = vmatpush.msra.mxu0 %v125_v16  ;;  %v176_v44 = vld [vmem:[#allocation7 + $0x10] sm:$0xff]  ;;  %v159_v45 = vld [vmem:[#allocation5 + $0x8] sm:$0xff]  ;;  %v158_v46 = vld [vmem:[#allocation5] sm:$0xff] }
  0x26   :  { %196 = vmatpush.msra.mxu1 %v183_v23  ;;  %217 = vmatpush.msra.mxu2 %v166_v24  ;;  %v175_v47 = vld [vmem:[#allocation7 + $0x8] sm:$0xff]  ;;  %v174_v48 = vld [vmem:[#allocation7] sm:$0xff]  ;;  %v251_v49 = vld [vmem:[#allocation8 + $0x78] sm:$0xff] }
  0x27   :  { %145 = vmatpush.msra.mxu0 %v124_v19  ;;  %v250_v50 = vld [vmem:[#allocation8 + $0x70] sm:$0xff]  ;;  %256 = vmatpush.msra.mxu3 %v251_v49  ;;  %v249_v51 = vld [vmem:[#allocation8 + $0x68] sm:$0xff]  ;;  %v248_v52 = vld [vmem:[#allocation8 + $0x60] sm:$0xff] }
  0x28   :  { %197 = vmatpush.msra.mxu1 %v182_v26  ;;  %218 = vmatpush.msra.mxu2 %v165_v27  ;;  %v247_v53 = vld [vmem:[#allocation8 + $0x58] sm:$0xff]  ;;  %v246_v54 = vld [vmem:[#allocation8 + $0x50] sm:$0xff]  ;;  %v245_v55 = vld [vmem:[#allocation8 + $0x48] sm:$0xff] }
  0x29   :  { %146 = vmatpush.msra.mxu0 %v123_v21  ;;  %257 = vmatpush.msra.mxu3 %v250_v50  ;;  %v244_v56 = vld [vmem:[#allocation8 + $0x40] sm:$0xff]  ;;  %v243_v57 = vld [vmem:[#allocation8 + $0x38] sm:$0xff]  ;;  %v242_v58 = vld [vmem:[#allocation8 + $0x30] sm:$0xff] }
  0x2a   :  { %198 = vmatpush.msra.mxu1 %v181_v29  ;;  %219 = vmatpush.msra.mxu2 %v164_v30  ;;  %v241_v59 = vld [vmem:[#allocation8 + $0x28] sm:$0xff]  ;;  %v240_v60 = vld [vmem:[#allocation8 + $0x20] sm:$0xff]  ;;  %v239_v0 = vld [vmem:[#allocation8 + $0x18] sm:$0xff] }
  0x2b   :  { %147 = vmatpush.msra.mxu0 %v122_v25  ;;  %258 = vmatpush.msra.mxu3 %v249_v51  ;;  %v349_v61 = vld [vmem:[%s611_s2] ss:$0 sm:$0xff]  ;;  %v238_v1 = vld [vmem:[#allocation8 + $0x10] sm:$0xff]  ;;  %v237_v2 = vld [vmem:[#allocation8 + $0x8] sm:$0xff] }
  0x2c   :  { %199 = vmatpush.msra.mxu1 %v180_v32  ;;  %220 = vmatpush.msra.mxu2 %v163_v33  ;;  %v236_v3 = vld [vmem:[#allocation8] sm:$0xff]  ;;  %v292_v4 = vld [vmem:[#allocation10 + $0x78] sm:$0xff]  ;;  %v291_v5 = vld [vmem:[#allocation10 + $0x70] sm:$0xff] }
  0x2d   :  { %148 = vmatpush.msra.mxu0 %v121_v28  ;;  %259 = vmatpush.msra.mxu3 %v248_v52  ;;  %v290_v6 = vld [vmem:[#allocation10 + $0x68] sm:$0xff]  ;;  %v289_v7 = vld [vmem:[#allocation10 + $0x60] sm:$0xff]  ;;  %v288_v8 = vld [vmem:[#allocation10 + $0x58] sm:$0xff] }
  0x2e   :  { %200 = vmatpush.msra.mxu1 %v179_v35  ;;  %221 = vmatpush.msra.mxu2 %v162_v36  ;;  %v287_v9 = vld [vmem:[#allocation10 + $0x50] sm:$0xff]  ;;  %v286_v10 = vld [vmem:[#allocation10 + $0x48] sm:$0xff]  ;;  %v285_v11 = vld [vmem:[#allocation10 + $0x40] sm:$0xff] }
  0x2f   :  { %149 = vmatpush.msra.mxu0 %v120_v31  ;;  %260 = vmatpush.msra.mxu3 %v247_v53  ;;  %v284_v12 = vld [vmem:[#allocation10 + $0x38] sm:$0xff]  ;;  %v283_v13 = vld [vmem:[#allocation10 + $0x30] sm:$0xff]  ;;  %v282_v14 = vld [vmem:[#allocation10 + $0x28] sm:$0xff] }
  0x30   :  { %201 = vmatpush.msra.mxu1 %v178_v38  ;;  %222 = vmatpush.msra.mxu2 %v161_v39  ;;  %v281_v15 = vld [vmem:[#allocation10 + $0x20] sm:$0xff]  ;;  %v280_v16 = vld [vmem:[#allocation10 + $0x18] sm:$0xff]  ;;  %v279_v23 = vld [vmem:[#allocation10 + $0x10] sm:$0xff] }
  0x31   :  { %150 = vmatpush.msra.mxu0 %v119_v34  ;;  %261 = vmatpush.msra.mxu3 %v246_v54  ;;  %v350_v18 = vld [vmem:[%s614_s5] ss:$0 sm:$0xff]  ;;  %v278_v24 = vld [vmem:[#allocation10 + $0x8] sm:$0xff]  ;;  %s512_s5 = smov [#allocation11]  }
  0x32   :  { %202 = vmatpush.msra.mxu1 %v177_v41  ;;  %223 = vmatpush.msra.mxu2 %v160_v43  ;;  %v277_v25 = vld [vmem:[#allocation10] sm:$0xff]  ;;  %s323_s26 = sshll.u32 %s512_s5, 4  ;;  %s324_s26 = int_to_ptr.vmem [resolvable:$true] %s323_s26 }
  0x33   :  { %151 = vmatpush.msra.mxu0 %v118_v37  ;;  %262 = vmatpush.msra.mxu3 %v245_v55  ;;  %v351_v26 = vld [vmem:[%s616_s7] ss:$0 sm:$0xff] }
  0x34   :  { %203 = vmatpush.msra.mxu1 %v176_v44  ;;  %224 = vmatpush.msra.mxu2 %v159_v45  ;;  %v352_v30 = vld [vmem:[%s618_s9] ss:$0 sm:$0xff] }
  0x35   :  { %152 = vmatpush.msra.mxu0 %v117_v40  ;;  %263 = vmatpush.msra.mxu3 %v244_v56 }
  0x36   :  { %153 = vmatmul.f32.vlgmr.msra.gmra.mxu0 %v116_v42  ;;  %225 = vmatpush.msra.mxu2 %v158_v46 }
  0x37   :  { %226 = vmatmul.f32.vlgmr.msra.gmra.mxu2 %v116_v42  ;;  %204 = vmatpush.msra.mxu1 %v175_v47 }
  0x38   :  { %264 = vmatpush.msra.mxu3 %v243_v57  ;;  %297 = vmatpush.msrb.mxu0 %v292_v4 }
  0x39   :  { %205 = vmatpush.msra.mxu1 %v174_v48 }
  0x3a   :  { %265 = vmatpush.msra.mxu3 %v242_v58  ;;  %298 = vmatpush.msrb.mxu0 %v291_v5 }
  0x3c   :  { %266 = vmatpush.msra.mxu3 %v241_v59  ;;  %299 = vmatpush.msrb.mxu0 %v290_v6 }
  0x3e   :  { %267 = vmatpush.msra.mxu3 %v240_v60  ;;  %300 = vmatpush.msrb.mxu0 %v289_v7 }
  0x40   :  { %268 = vmatpush.msra.mxu3 %v239_v0  ;;  %301 = vmatpush.msrb.mxu0 %v288_v8 }
  0x42   :  { %269 = vmatpush.msra.mxu3 %v238_v1  ;;  %302 = vmatpush.msrb.mxu0 %v287_v9 }
  0x44   :  { %270 = vmatpush.msra.mxu3 %v237_v2  ;;  %303 = vmatpush.msrb.mxu0 %v286_v10 }
  0x46   :  { %271 = vmatpush.msra.mxu3 %v236_v3  ;;  %304 = vmatpush.msrb.mxu0 %v285_v11 }
  0x48   :  { %305 = vmatpush.msrb.mxu0 %v284_v12 }
  0x4a   :  { %306 = vmatpush.msrb.mxu0 %v283_v13 }
  0x4c   :  { %307 = vmatpush.msrb.mxu0 %v282_v14 }
  0x4e   :  { %308 = vmatpush.msrb.mxu0 %v281_v15 }
  0x50   :  { %309 = vmatpush.msrb.mxu0 %v280_v16 }
  0x52   :  { %310 = vmatpush.msrb.mxu0 %v279_v23 }
  0x54   :  { %311 = vmatpush.msrb.mxu0 %v278_v24 }
  0x56   :  { %312 = vmatpush.msrb.mxu0 %v277_v25 }
  0xb3   :  { %v154_v62 = vpop.f32.mrf.mxu0 }
  0xb4   :  { %v155_v63 = vadd.f32 %v349_v61, %v154_v62 }
  0xb6   :  { %157 = vst [vmem:[#allocation11] sm:$0xff] %v155_v63  ;;  %206 = vmatmul.f32.vlgmr.msra.gmra.mxu1 %v155_v63 }
  0xb7   :  { %328 = dma.vmem_to_hbm [thread:$0]  %s324_s26, 128, %s326_s29, [#allocation4]  }
  0xba   :  { %v227_v17 = vpop.f32.mrf.mxu2 }
 0x133   :  { %v207_v19 = vpop.f32.mrf.mxu1 }
 0x134   :  { %v228_v20 = vadd.f32 %v227_v17, %v207_v19 }
 0x136   :  { %v234_v21 = vadd.f32 %v350_v18, %v228_v20 }
 0x138   :  { %v235_v22 = vmax.f32 %v234_v21, 0.0 }
 0x13a   :  { %272 = vmatmul.f32.vlgmr.msra.gmra.mxu3 %v235_v22 }
 0x1bd   :  { %v273_v27 = vpop.f32.mrf.mxu3 }
 0x1be   :  { %v274_v28 = vadd.f32 %v351_v26, %v273_v27 }
 0x1c0   :  { %v276_v29 = vmax.f32 %v274_v28, 0.0 }
 0x1c2   :  { %313 = vmatmul.f32.vlgmr.msrb.gmra.mxu0 %v276_v29 }
 0x23f   :  { %v314_v31 = vpop.f32.mrf.mxu0 }
 0x240   :  { %v315_v32 = vadd.f32 %v352_v30, %v314_v31 }
 0x242   :  { %317 = vst [vmem:[%s620_s11] sm:$0xff] %v315_v32 }
 0x243   :  { %503 = dma.done.wait [#allocation4], 128  }
 0x244   :  { %504 = vsyncadd [#allocation4], 4294967168 }
 0x245   :  { %337 = vsyncpa [#allocation3], 1 }
 0x246   :  { %338 = vsyncpa [#allocation6], 1 }
 0x247   :  { %339 = vsyncpa [#allocation9], 1 }
 0x248   :  { %340 = vsyncpa [#allocation4], 1 }

</bundles_post_ra>
